<compile_context>
chip_gen: v6e
topology: v6e:2x2x1
jax: 0.10.0
libtpu: 0.0.40
codegen_flags: <defaults>
</compile_context>

<pallas_src>
import functools

import jax
import jax.numpy as jnp
from jax.experimental import pallas as pl
from jax.experimental.pallas import tpu as pltpu


def _round_up(x, m):
    return ((x + m - 1) // m) * m


def mlp_kernel(x_ref, w1_ref, b1_ref, w2_ref, b2_ref, w3_ref, b3_ref, o_ref):
    # x arrives as raw f32 rows (no wrapper-side copy); cast to bf16 on the
    # VPU right before the MXU pass. Accumulate every matmul in f32.
    xb = x_ref[...].astype(jnp.bfloat16)
    # fc1 + ReLU
    h1 = jnp.dot(xb, w1_ref[...], preferred_element_type=jnp.float32)
    h1 = jnp.maximum(h1 + b1_ref[...], 0.0).astype(jnp.bfloat16)
    # fc2 + ReLU (out padded 64 -> 128, zero bias in the pad -> relu keeps 0)
    h2 = jnp.dot(h1, w2_ref[...], preferred_element_type=jnp.float32)
    h2 = jnp.maximum(h2 + b2_ref[...], 0.0).astype(jnp.bfloat16)
    # fc3 (no activation), lane-dense 128-wide bf16 store
    h3 = jnp.dot(h2, w3_ref[...], preferred_element_type=jnp.float32)
    o_ref[...] = (h3 + b3_ref[...]).astype(o_ref.dtype)


def prepare_params(w1, b1, w2, b2, w3, b3):
    """One-time weight prep (call OUTSIDE the hot path and reuse the result).

    w_i: [in, out] f32, b_i: [out] f32. Pads fc2/fc3 output dims to 128 lanes
    and casts weights to bf16. Zero-padding is mathematically exact: padded
    fc2 columns get zero weight + zero bias -> relu 0 -> killed by zero-padded
    w3 rows; padded fc3 columns are sliced off in the wrapper.
    """
    bf = jnp.bfloat16
    H1 = w1.shape[1]                      # 256
    H2_raw = w2.shape[1]                  # 64
    OUT_raw = w3.shape[1]                 # 10
    H2 = _round_up(H2_raw, 128)           # 128
    OUT = _round_up(OUT_raw, 128)         # 128

    w1_p = w1.astype(bf)                                              # [784, 256]
    b1_p = b1.reshape(1, H1).astype(jnp.float32)                      # [1, 256]
    w2_p = jnp.zeros((H1, H2), bf).at[:, :H2_raw].set(w2.astype(bf))  # [256, 128]
    b2_p = jnp.zeros((1, H2), jnp.float32).at[:, :H2_raw].set(b2.reshape(1, -1))
    w3_p = jnp.zeros((H2, OUT), bf).at[:H2_raw, :OUT_raw].set(w3.astype(bf))
    b3_p = jnp.zeros((1, OUT), jnp.float32).at[:, :OUT_raw].set(b3.reshape(1, -1))
    return (w1_p, b1_p, w2_p, b2_p, w3_p, b3_p)


@functools.partial(jax.jit, static_argnames=("max_block_b", "out_features"))
def mlp_forward(x, params, max_block_b=512, out_features=10):
    """x: [B, 784] f32; params from prepare_params(). Returns [B, 10] f32."""
    w1_p, b1_p, w2_p, b2_p, w3_p, b3_p = params
    B, K = x.shape                        # K = 784 (unpadded feature dim)
    H1 = w1_p.shape[1]                    # 256
    H2 = w2_p.shape[1]                    # 128 (padded)
    OUT = w3_p.shape[1]                   # 128 (padded)

    # Batch tile: multiple of 8 sublanes, capped at max_block_b, and split so
    # the grid has >= 2 steps for moderate/large B (keeps both v7x TCs busy).
    TB = min(max_block_b, max(8, _round_up(-(-B // 2), 8)))
    B_pad = _round_up(B, TB)
    if B_pad != B:
        # Only pads the batch dim (no feature-dim copy); zero when B % TB == 0.
        x = jnp.pad(x, ((0, B_pad - B), (0, 0)))

    grid = (B_pad // TB,)
    out = pl.pallas_call(
        mlp_kernel,
        out_shape=jax.ShapeDtypeStruct((B_pad, OUT), jnp.bfloat16),
        grid_spec=pltpu.PrefetchScalarGridSpec(
            num_scalar_prefetch=0,
            grid=grid,
            in_specs=[
                # batch-tiled activation input (double-buffered by Pallas);
                # last dim 784 == full array dim -> legal without 128-padding.
                pl.BlockSpec((TB, K), lambda i: (i, 0)),
                # weights / biases: constant block index -> VMEM-resident,
                # never re-DMA'd across grid steps.
                pl.BlockSpec((K, H1), lambda i: (0, 0)),
                pl.BlockSpec((1, H1), lambda i: (0, 0)),
                pl.BlockSpec((H1, H2), lambda i: (0, 0)),
                pl.BlockSpec((1, H2), lambda i: (0, 0)),
                pl.BlockSpec((H2, OUT), lambda i: (0, 0)),
                pl.BlockSpec((1, OUT), lambda i: (0, 0)),
            ],
            out_specs=pl.BlockSpec((TB, OUT), lambda i: (i, 0)),
        ),
        compiler_params=pltpu.CompilerParams(
            # batch steps are independent -> shard over v7x's 2 TensorCores
            dimension_semantics=("parallel",),
        ),
    )(x, w1_p, b1_p, w2_p, b2_p, w3_p, b3_p)
    return out[:B, :out_features].astype(jnp.float32)


def init_linear(key, fan_in, fan_out):
    # PyTorch nn.Linear default init: U(-1/sqrt(fan_in), 1/sqrt(fan_in)),
    # weight stored as [in, out] so the kernel does x @ W.
    kw, kb = jax.random.split(key)
    bound = 1.0 / jnp.sqrt(fan_in)
    w = jax.random.uniform(kw, (fan_in, fan_out), jnp.float32, -bound, bound)
    b = jax.random.uniform(kb, (fan_out,), jnp.float32, -bound, bound)
    return w, b


if __name__ == "__main__":
    key = jax.random.PRNGKey(0)
    kx, k1, k2, k3 = jax.random.split(key, 4)

    B = 8
    x = jax.random.normal(kx, (B, 28 * 28), jnp.float32)

    w1, b1 = init_linear(k1, 28 * 28, 256)
    w2, b2 = init_linear(k2, 256, 64)
    w3, b3 = init_linear(k3, 64, 10)

    params = prepare_params(w1, b1, w2, b2, w3, b3)   # one-time, outside hot path
    out = mlp_forward(x, params)
    out = jax.block_until_ready(out)
    assert out.shape == (B, 10)

    # Reference mirroring the kernel precision (bf16 operands, f32 accum,
    # bf16 final store).
    bf = jnp.bfloat16
    xb, w1b, w2b, w3b = (a.astype(bf) for a in (x, w1, w2, w3))
    r = jnp.maximum(jnp.dot(xb, w1b, preferred_element_type=jnp.float32) + b1, 0.0).astype(bf)
    r = jnp.maximum(jnp.dot(r, w2b, preferred_element_type=jnp.float32) + b2, 0.0).astype(bf)
    r = (jnp.dot(r, w3b, preferred_element_type=jnp.float32) + b3).astype(bf).astype(jnp.float32)
    assert jnp.allclose(out, r, atol=1e-2, rtol=1e-2)

    # Loose check against the full-f32 PyTorch-equivalent forward.
    f = jnp.maximum(x @ w1 + b1, 0.0)
    f = jnp.maximum(f @ w2 + b2, 0.0)
    f = f @ w3 + b3
    assert jnp.allclose(out, f, atol=1e-1, rtol=1e-1)

    print("KERNEL_OK")
</pallas_src>

<mosaic_0001>
module attributes {stable_mosaic.version = 11 : i64} {
  func.func @mlp_kernel(%arg0: i32, %arg1: memref<8x784xf32, #tpu.memory_space<vmem>>, %arg2: memref<784x256xbf16, #tpu.memory_space<vmem>>, %arg3: memref<1x256xf32, #tpu.memory_space<vmem>>, %arg4: memref<256x128xbf16, #tpu.memory_space<vmem>>, %arg5: memref<1x128xf32, #tpu.memory_space<vmem>>, %arg6: memref<128x128xbf16, #tpu.memory_space<vmem>>, %arg7: memref<1x128xf32, #tpu.memory_space<vmem>>, %arg8: memref<8x128xbf16, #tpu.memory_space<vmem>>) attributes {dimension_semantics = [#tpu.dimension_semantics<parallel>], iteration_bounds = array<i64: 1>, scalar_prefetch = 0 : i64, scratch_operands = 0 : i64, tpu.core_type = #tpu.core_type<tc>, window_params = [{transform_indices = @transform_0, window_bounds = array<i64: 8, 784>}, {pipeline_mode = #tpu.pipeline_mode<synchronous>, transform_indices = @transform_1, window_bounds = array<i64: 784, 256>}, {pipeline_mode = #tpu.pipeline_mode<synchronous>, transform_indices = @transform_2, window_bounds = array<i64: 1, 256>}, {pipeline_mode = #tpu.pipeline_mode<synchronous>, transform_indices = @transform_3, window_bounds = array<i64: 256, 128>}, {pipeline_mode = #tpu.pipeline_mode<synchronous>, transform_indices = @transform_4, window_bounds = array<i64: 1, 128>}, {pipeline_mode = #tpu.pipeline_mode<synchronous>, transform_indices = @transform_5, window_bounds = array<i64: 128, 128>}, {pipeline_mode = #tpu.pipeline_mode<synchronous>, transform_indices = @transform_6, window_bounds = array<i64: 1, 128>}, {transform_indices = @transform_7, window_bounds = array<i64: 8, 128>}]} {
    %c0 = arith.constant 0 : index
    %c0_0 = arith.constant 0 : index
    %0 = vector.load %arg1[%c0, %c0_0] : memref<8x784xf32, #tpu.memory_space<vmem>>, vector<8x784xf32>
    %1 = arith.truncf %0 : vector<8x784xf32> to vector<8x784xbf16>
    %c0_1 = arith.constant 0 : index
    %c0_2 = arith.constant 0 : index
    %2 = vector.load %arg2[%c0_1, %c0_2] : memref<784x256xbf16, #tpu.memory_space<vmem>>, vector<784x256xbf16>
    %cst = arith.constant dense<0.000000e+00> : vector<8x256xf32>
    %3 = tpu.matmul %1, %2, %cst {dimension_numbers = #tpu.dot_dimension_numbers<[1], [0], [0], [1], [0, 0, 1, 1], [], []>} : vector<8x784xbf16>, vector<784x256xbf16>, vector<8x256xf32> -> vector<8x256xf32>
    %c0_3 = arith.constant 0 : index
    %c0_4 = arith.constant 0 : index
    %4 = vector.load %arg3[%c0_3, %c0_4] : memref<1x256xf32, #tpu.memory_space<vmem>>, vector<1x256xf32>
    %5 = vector.broadcast %4 : vector<1x256xf32> to vector<8x256xf32>
    %6 = arith.addf %3, %5 : vector<8x256xf32>
    %cst_5 = arith.constant 0.000000e+00 : f32
    %7 = vector.broadcast %cst_5 : f32 to vector<8x256xf32>
    %8 = arith.maximumf %6, %7 : vector<8x256xf32>
    %9 = arith.truncf %8 : vector<8x256xf32> to vector<8x256xbf16>
    %c0_6 = arith.constant 0 : index
    %c0_7 = arith.constant 0 : index
    %10 = vector.load %arg4[%c0_6, %c0_7] : memref<256x128xbf16, #tpu.memory_space<vmem>>, vector<256x128xbf16>
    %cst_8 = arith.constant dense<0.000000e+00> : vector<8x128xf32>
    %11 = tpu.matmul %9, %10, %cst_8 {dimension_numbers = #tpu.dot_dimension_numbers<[1], [0], [0], [1], [0, 0, 1, 1], [], []>} : vector<8x256xbf16>, vector<256x128xbf16>, vector<8x128xf32> -> vector<8x128xf32>
    %c0_9 = arith.constant 0 : index
    %c0_10 = arith.constant 0 : index
    %12 = vector.load %arg5[%c0_9, %c0_10] : memref<1x128xf32, #tpu.memory_space<vmem>>, vector<1x128xf32>
    %13 = vector.broadcast %12 : vector<1x128xf32> to vector<8x128xf32>
    %14 = arith.addf %11, %13 : vector<8x128xf32>
    %cst_11 = arith.constant 0.000000e+00 : f32
    %15 = vector.broadcast %cst_11 : f32 to vector<8x128xf32>
    %16 = arith.maximumf %14, %15 : vector<8x128xf32>
    %17 = arith.truncf %16 : vector<8x128xf32> to vector<8x128xbf16>
    %c0_12 = arith.constant 0 : index
    %c0_13 = arith.constant 0 : index
    %18 = vector.load %arg6[%c0_12, %c0_13] : memref<128x128xbf16, #tpu.memory_space<vmem>>, vector<128x128xbf16>
    %cst_14 = arith.constant dense<0.000000e+00> : vector<8x128xf32>
    %19 = tpu.matmul %17, %18, %cst_14 {dimension_numbers = #tpu.dot_dimension_numbers<[1], [0], [0], [1], [0, 0, 1, 1], [], []>} : vector<8x128xbf16>, vector<128x128xbf16>, vector<8x128xf32> -> vector<8x128xf32>
    %c0_15 = arith.constant 0 : index
    %c0_16 = arith.constant 0 : index
    %20 = vector.load %arg7[%c0_15, %c0_16] : memref<1x128xf32, #tpu.memory_space<vmem>>, vector<1x128xf32>
    %21 = vector.broadcast %20 : vector<1x128xf32> to vector<8x128xf32>
    %22 = arith.addf %19, %21 : vector<8x128xf32>
    %23 = arith.truncf %22 : vector<8x128xf32> to vector<8x128xbf16>
    %c0_17 = arith.constant 0 : index
    %c0_18 = arith.constant 0 : index
    %24 = vector.load %arg8[%c0_17, %c0_18] : memref<8x128xbf16, #tpu.memory_space<vmem>>, vector<8x128xbf16>
    tpu.vector_store %arg8[%c0_17, %c0_18], %23 {strides = array<i32>} : memref<8x128xbf16, #tpu.memory_space<vmem>>, vector<8x128xbf16>,
    return
  }
  func.func @transform_0(%arg0: i32) -> (i32, i32) {
    %c0_i32 = arith.constant 0 : i32
    %c0_i32_0 = arith.constant 0 : i32
    return %arg0, %c0_i32 : i32, i32
  }
  func.func @transform_1(%arg0: i32) -> (i32, i32) {
    %c0_i32 = arith.constant 0 : i32
    %c0_i32_0 = arith.constant 0 : i32
    %c0_i32_1 = arith.constant 0 : i32
    return %c0_i32, %c0_i32_0 : i32, i32
  }
  func.func @transform_2(%arg0: i32) -> (i32, i32) {
    %c0_i32 = arith.constant 0 : i32
    %c0_i32_0 = arith.constant 0 : i32
    %c0_i32_1 = arith.constant 0 : i32
    return %c0_i32, %c0_i32_0 : i32, i32
  }
  func.func @transform_3(%arg0: i32) -> (i32, i32) {
    %c0_i32 = arith.constant 0 : i32
    %c0_i32_0 = arith.constant 0 : i32
    %c0_i32_1 = arith.constant 0 : i32
    return %c0_i32, %c0_i32_0 : i32, i32
  }
  func.func @transform_4(%arg0: i32) -> (i32, i32) {
    %c0_i32 = arith.constant 0 : i32
    %c0_i32_0 = arith.constant 0 : i32
    %c0_i32_1 = arith.constant 0 : i32
    return %c0_i32, %c0_i32_0 : i32, i32
  }
  func.func @transform_5(%arg0: i32) -> (i32, i32) {
    %c0_i32 = arith.constant 0 : i32
    %c0_i32_0 = arith.constant 0 : i32
    %c0_i32_1 = arith.constant 0 : i32
    return %c0_i32, %c0_i32_0 : i32, i32
  }
  func.func @transform_6(%arg0: i32) -> (i32, i32) {
    %c0_i32 = arith.constant 0 : i32
    %c0_i32_0 = arith.constant 0 : i32
    %c0_i32_1 = arith.constant 0 : i32
    return %c0_i32, %c0_i32_0 : i32, i32
  }
  func.func @transform_7(%arg0: i32) -> (i32, i32) {
    %c0_i32 = arith.constant 0 : i32
    %c0_i32_0 = arith.constant 0 : i32
    return %arg0, %c0_i32 : i32, i32
  }
}

</mosaic_0001>

<bundles_post_ra>
// kernel: mlp_forward.1
= control target key start
LH: loop header
LB: loop body
LE: loop exit
PB: predicated region body
PF: predicated region fallthrough
CT: control target
= control target key end

     0   :  { %12 = vsyncpa [#allocation3], 0  ;;  %s1692_s0 = inlined_call_operand.hbm [shape: f32[8,784], index: 0, kind: input, shape index: {}]   ;;  %s1693_s1 = inlined_call_operand.hbm [shape: bf16[784,256], index: 1, kind: input, shape index: {}]   ;;  %s1694_s2 = inlined_call_operand.vmem [shape: f32[1,256], index: 2, kind: input, shape index: {}]   ;;  %s1695_s3 = inlined_call_operand.hbm [shape: bf16[256,128], index: 3, kind: input, shape index: {}]   ;;  %s1696_s4 = inlined_call_operand.vmem [shape: f32[1,128], index: 4, kind: input, shape index: {}]   ;;  %s1697_s5 = inlined_call_operand.hbm [shape: bf16[128,128], index: 5, kind: input, shape index: {}]   ;;  %s1698_s6 = inlined_call_operand.vmem [shape: f32[1,128], index: 6, kind: input, shape index: {}]   ;;  %s1699_s7 = inlined_call_operand.vmem [shape: bf16[8,128], index: 7, kind: output, shape index: {}]  }
   0x1   :  { %13 = vsyncpa [#allocation5], 0 }
   0x2   :  { %14 = vsyncpa [#allocation8], 0  ;;  %s1607_s24 = smov [#allocation4]  }
   0x3   :  { %s30_s25 = sshll.u32 %s1607_s24, 4  ;;  %s31_s25 = int_to_ptr.vmem [resolvable:$true] %s30_s25 }
   0x4   :  { %s1529_s26 = scalar_lea.vmem %s31_s25, 12544  ;;  %p1534_p1 = scmp.lt.s32.totalorder %s31_s25, %s31_s25 }
   0x5   :  { %p1530_p0 = scmp.ne.s32.totalorder %s31_s25, %s1529_s26  ;;  %p1535_p2 = scmp.lt.s32.totalorder %s1529_s26, %s1529_s26 }
   0x7   :  { %p1536_p3 = por %p1535_p2, %p1534_p1 }
   0x9   :  { %p1537_p4 = pnand %p1536_p3, %p1530_p0 }
   0xb   :  { %1540 = shalt.err (!%p1537_p4)
}
   0xc   :  { %s1608_s27 = smov 128   ;;  %s1609_s28 = smov 8  }
   0xd   :  { %36 = dma.hbm_to_vmem [thread:$0]  %s1693_s1, 12544, %s31_s25, [#allocation5], %s1608_s27, %s1608_s27, %s1609_s28  }
   0xe   :  { %s1610_s8 = smov [#allocation2]   ;;  %s1611_s10 = smov [#allocation6]  }
   0xf   :  { %s21_s9 = sshll.u32 %s1610_s8, 4  ;;  %s44_s11 = sshll.u32 %s1611_s10, 4  ;;  %s22_s9 = int_to_ptr.vmem [resolvable:$true] %s21_s9  ;;  %s45_s11 = int_to_ptr.vmem [resolvable:$true] %s44_s11 }
  0x10   :  { %s1549_s12 = scalar_lea.vmem %s22_s9, 896  ;;  %p1554_p6 = scmp.lt.s32.totalorder %s22_s9, %s22_s9 }
  0x11   :  { %p1550_p5 = scmp.ne.s32.totalorder %s22_s9, %s1549_s12  ;;  %p1555_p7 = scmp.lt.s32.totalorder %s1549_s12, %s1549_s12 }
  0x13   :  { %p1556_p8 = por %p1555_p7, %p1554_p6 }
  0x15   :  { %p1557_p9 = pnand %p1556_p8, %p1550_p5 }
  0x17   :  { %1560 = shalt.err (!%p1557_p9)
}
  0x18   :  { %24 = dma.hbm_to_vmem [thread:$0]  %s1692_s0, 896, %s22_s9, [#allocation3]  }
  0x19   :  { %s1569_s15 = scalar_lea.vmem %s45_s11, 2048  ;;  %p1574_p11 = scmp.lt.s32.totalorder %s45_s11, %s45_s11 }
  0x1a   :  { %p1570_p10 = scmp.ne.s32.totalorder %s45_s11, %s1569_s15  ;;  %p1575_p12 = scmp.lt.s32.totalorder %s1569_s15, %s1569_s15 }
  0x1c   :  { %p1576_p13 = por %p1575_p12, %p1574_p11 }
  0x1e   :  { %p1577_p0 = pnand %p1576_p13, %p1570_p10 }
  0x20   :  { %1580 = shalt.err (!%p1577_p0)
}
  0x21   :  { %s1612_s1 = smov 64   ;;  %s1613_s16 = smov 4  }
  0x22   :  { %50 = dma.hbm_to_vmem [thread:$0]  %s1695_s3, 2048, %s45_s11, [#allocation5], %s1612_s1, %s1612_s1, %s1613_s16  }
  0x23   :  { %s1614_s19 = smov [#allocation7]  }
  0x24   :  { %s58_s20 = sshll.u32 %s1614_s19, 4  ;;  %s59_s20 = int_to_ptr.vmem [resolvable:$true] %s58_s20 }
  0x25   :  { %s1589_s21 = scalar_lea.vmem %s59_s20, 1024  ;;  %p1594_p2 = scmp.lt.s32.totalorder %s59_s20, %s59_s20 }
  0x26   :  { %p1590_p1 = scmp.ne.s32.totalorder %s59_s20, %s1589_s21  ;;  %p1595_p3 = scmp.lt.s32.totalorder %s1589_s21, %s1589_s21 }
  0x28   :  { %p1596_p4 = por %p1595_p3, %p1594_p2 }
  0x2a   :  { %p1597_p5 = pnand %p1596_p4, %p1590_p1 }
  0x2c   :  { %1600 = shalt.err (!%p1597_p5)
}
  0x2d   :  { %64 = dma.hbm_to_vmem [thread:$0]  %s1697_s5, 1024, %s59_s20, [#allocation8], %s1612_s1, %s1612_s1, %s1613_s16  }
  0x2e   :  { %1601 = dma.done.wait [#allocation3], 896  }
  0x2f   :  { %1602 = vsyncadd [#allocation3], 4294966400 }
  0x30   :  { %1603 = dma.done.wait [#allocation5], 14592  }
  0x31   :  { %1604 = vsyncadd [#allocation5], 4294952704 }
  0x32   :  { %1605 = dma.done.wait [#allocation8], 1024  }
  0x33   :  { %1606 = vsyncadd [#allocation8], 4294966272  ;;  %v1350_v0 = vld [vmem:[#allocation4 + $0x74] ss:$8 sps:$4 sm:$0xff]   ;;  %v1352_v1 = vld [vmem:[#allocation4 + $0x70] ss:$8 sps:$4 sm:$0xff]  }
  0x34   :  { %698 = vmatprep.subr.bf16.mxu0 %v1350_v0  ;;  %v1353_v2 = vld [vmem:[#allocation4 + $0x174] ss:$8 sps:$4 sm:$0xff]   ;;  %v1355_v3 = vld [vmem:[#allocation4 + $0x170] ss:$8 sps:$4 sm:$0xff]   ;;  %v1356_v4 = vld [vmem:[#allocation4 + $0x64] ss:$8 sps:$4 sm:$0xff]  }
  0x35   :  { %699 = vmatpush1.bf16.msra.mxu0 %v1352_v1  ;;  %v1358_v5 = vld [vmem:[#allocation4 + $0x60] ss:$8 sps:$4 sm:$0xff]   ;;  %739 = vmatprep.subr.bf16.mxu1 %v1353_v2  ;;  %v1359_v6 = vld [vmem:[#allocation4 + $0x164] ss:$8 sps:$4 sm:$0xff]   ;;  %v1362_v8 = vld [vmem:[#allocation4 + $0x54] ss:$8 sps:$4 sm:$0xff]  }
  0x36   :  { %740 = vmatpush1.bf16.msra.mxu1 %v1355_v3  ;;  %700 = vmatprep.subr.bf16.mxu0 %v1356_v4  ;;  %v1361_v7 = vld [vmem:[#allocation4 + $0x160] ss:$8 sps:$4 sm:$0xff]   ;;  %v1364_v9 = vld [vmem:[#allocation4 + $0x50] ss:$8 sps:$4 sm:$0xff]   ;;  %v1365_v10 = vld [vmem:[#allocation4 + $0x154] ss:$8 sps:$4 sm:$0xff]  }
  0x37   :  { %741 = vmatprep.subr.bf16.mxu1 %v1359_v6  ;;  %v1368_v11 = vld [vmem:[#allocation4 + $0x44] ss:$8 sps:$4 sm:$0xff]   ;;  %v1367_v12 = vld [vmem:[#allocation4 + $0x150] ss:$8 sps:$4 sm:$0xff]   ;;  %v1370_v14 = vld [vmem:[#allocation4 + $0x40] ss:$8 sps:$4 sm:$0xff]  }
  0x38   :  { %v1371_v13 = vld [vmem:[#allocation4 + $0x144] ss:$8 sps:$4 sm:$0xff]   ;;  %v1374_v15 = vld [vmem:[#allocation4 + $0x34] ss:$8 sps:$4 sm:$0xff]   ;;  %v1373_v16 = vld [vmem:[#allocation4 + $0x140] ss:$8 sps:$4 sm:$0xff]  }
  0x39   :  { %701 = vmatpush1.bf16.msra.mxu0 %v1358_v5  ;;  %v1377_v17 = vld [vmem:[#allocation4 + $0x134] ss:$8 sps:$4 sm:$0xff]   ;;  %v1376_v18 = vld [vmem:[#allocation4 + $0x30] ss:$8 sps:$4 sm:$0xff]   ;;  %v1380_v19 = vld [vmem:[#allocation4 + $0x24] ss:$8 sps:$4 sm:$0xff]  }
  0x3a   :  { %702 = vmatprep.subr.bf16.mxu0 %v1362_v8  ;;  %742 = vmatpush1.bf16.msra.mxu1 %v1361_v7  ;;  %v1379_v20 = vld [vmem:[#allocation4 + $0x130] ss:$8 sps:$4 sm:$0xff]   ;;  %v1383_v21 = vld [vmem:[#allocation4 + $0x124] ss:$8 sps:$4 sm:$0xff]   ;;  %v1382_v22 = vld [vmem:[#allocation4 + $0x20] ss:$8 sps:$4 sm:$0xff]  }
  0x3b   :  { %743 = vmatprep.subr.bf16.mxu1 %v1365_v10  ;;  %v1386_v23 = vld [vmem:[#allocation4 + $0x14] ss:$8 sps:$4 sm:$0xff]   ;;  %v1385_v24 = vld [vmem:[#allocation4 + $0x120] ss:$8 sps:$4 sm:$0xff]   ;;  %v1388_v26 = vld [vmem:[#allocation4 + $0x10] ss:$8 sps:$4 sm:$0xff]  }
  0x3c   :  { %v1389_v25 = vld [vmem:[#allocation4 + $0x114] ss:$8 sps:$4 sm:$0xff]   ;;  %v1392_v27 = vld [vmem:[#allocation4 + $0x4] ss:$8 sps:$4 sm:$0xff]   ;;  %v1391_v28 = vld [vmem:[#allocation4 + $0x110] ss:$8 sps:$4 sm:$0xff]  }
  0x3d   :  { %703 = vmatpush1.bf16.msra.mxu0 %v1364_v9  ;;  %v1395_v29 = vld [vmem:[#allocation4 + $0x104] ss:$8 sps:$4 sm:$0xff]   ;;  %v1394_v30 = vld [vmem:[#allocation4] ss:$8 sps:$4 sm:$0xff]   ;;  %v1398_v31 = vld [vmem:[#allocation4 + $0xf4] ss:$8 sps:$4 sm:$0xff]  }
  0x3e   :  { %704 = vmatprep.subr.bf16.mxu0 %v1368_v11  ;;  %744 = vmatpush1.bf16.msra.mxu1 %v1367_v12  ;;  %v1397_v32 = vld [vmem:[#allocation4 + $0x100] ss:$8 sps:$4 sm:$0xff]   ;;  %v1401_v33 = vld [vmem:[#allocation4 + $0x1f4] ss:$8 sps:$4 sm:$0xff]   ;;  %v1400_v34 = vld [vmem:[#allocation4 + $0xf0] ss:$8 sps:$4 sm:$0xff]  }
  0x3f   :  { %745 = vmatprep.subr.bf16.mxu1 %v1371_v13  ;;  %v1404_v35 = vld [vmem:[#allocation4 + $0xe4] ss:$8 sps:$4 sm:$0xff]   ;;  %v1403_v36 = vld [vmem:[#allocation4 + $0x1f0] ss:$8 sps:$4 sm:$0xff]   ;;  %v1406_v38 = vld [vmem:[#allocation4 + $0xe0] ss:$8 sps:$4 sm:$0xff]  }
  0x40   :  { %v1407_v37 = vld [vmem:[#allocation4 + $0x1e4] ss:$8 sps:$4 sm:$0xff]   ;;  %v1410_v39 = vld [vmem:[#allocation4 + $0xd4] ss:$8 sps:$4 sm:$0xff]   ;;  %v1409_v40 = vld [vmem:[#allocation4 + $0x1e0] ss:$8 sps:$4 sm:$0xff]  }
  0x41   :  { %705 = vmatpush1.bf16.msra.mxu0 %v1370_v14  ;;  %v1413_v41 = vld [vmem:[#allocation4 + $0x1d4] ss:$8 sps:$4 sm:$0xff]   ;;  %v1412_v42 = vld [vmem:[#allocation4 + $0xd0] ss:$8 sps:$4 sm:$0xff]   ;;  %v1416_v43 = vld [vmem:[#allocation4 + $0xc4] ss:$8 sps:$4 sm:$0xff]  }
  0x42   :  { %706 = vmatprep.subr.bf16.mxu0 %v1374_v15  ;;  %746 = vmatpush1.bf16.msra.mxu1 %v1373_v16  ;;  %v1415_v44 = vld [vmem:[#allocation4 + $0x1d0] ss:$8 sps:$4 sm:$0xff]   ;;  %v1419_v45 = vld [vmem:[#allocation4 + $0x1c4] ss:$8 sps:$4 sm:$0xff]   ;;  %v1418_v47 = vld [vmem:[#allocation4 + $0xc0] ss:$8 sps:$4 sm:$0xff]  }
  0x43   :  { %747 = vmatprep.subr.bf16.mxu1 %v1377_v17  ;;  %v81_v46 = vld [vmem:[#allocation2 + $0x8] sm:$0xff]  ;;  %v83_v50 = vld [vmem:[#allocation2 + $0x18] sm:$0xff]  ;;  %v80_v4 = vld [vmem:[#allocation2] sm:$0xff]  ;;  %vm694_vm0 = vcmask 130048   ;;  %vm1617_vm1 = vmmov 0  }
  0x44   :  { %v88_v48 = vpack.c.bf16 %v81_v46, %v81_v46  ;;  %v1422_v49 = vld [vmem:[#allocation4 + $0xb4] ss:$8 sps:$4 sm:$0xff]   ;;  %v1421_v51 = vld [vmem:[#allocation4 + $0x1c0] ss:$8 sps:$4 sm:$0xff]   ;;  %v90_v52 = vpack.c.bf16 %v83_v50, %v83_v50  ;;  %v1424_v54 = vld [vmem:[#allocation4 + $0xb0] ss:$8 sps:$4 sm:$0xff]   ;;  %v87_v7 = vpack.c.bf16 %v80_v4, %v80_v4 }
  0x45   :  { %707 = vmatpush1.bf16.msra.mxu0 %v1376_v18  ;;  %v1425_v53 = vld [vmem:[#allocation4 + $0x1b4] ss:$8 sps:$4 sm:$0xff]   ;;  %v1428_v55 = vld [vmem:[#allocation4 + $0xa4] ss:$8 sps:$4 sm:$0xff]   ;;  %v1427_v56 = vld [vmem:[#allocation4 + $0x1b0] ss:$8 sps:$4 sm:$0xff]  }
  0x46   :  { %708 = vmatprep.subr.bf16.mxu0 %v1380_v19  ;;  %748 = vmatpush1.bf16.msra.mxu1 %v1379_v20  ;;  %v1431_v57 = vld [vmem:[#allocation4 + $0x1a4] ss:$8 sps:$4 sm:$0xff]   ;;  %v1430_v58 = vld [vmem:[#allocation4 + $0xa0] ss:$8 sps:$4 sm:$0xff]   ;;  %v1434_v59 = vld [vmem:[#allocation4 + $0x94] ss:$8 sps:$4 sm:$0xff]  }
  0x47   :  { %749 = vmatprep.subr.bf16.mxu1 %v1383_v21  ;;  %730 = vmatprep.mubr.bf16.mxu0 %v88_v48  ;;  %v1433_v60 = vld [vmem:[#allocation4 + $0x1a0] ss:$8 sps:$4 sm:$0xff]   ;;  %v1437_v61 = vld [vmem:[#allocation4 + $0x194] ss:$8 sps:$4 sm:$0xff]   ;;  %v1436_v62 = vld [vmem:[#allocation4 + $0x90] ss:$8 sps:$4 sm:$0xff]  }
  0x48   :  { %771 = vmatprep.mubr.bf16.mxu1 %v90_v52  ;;  %v1440_v63 = vld [vmem:[#allocation4 + $0x84] ss:$8 sps:$4 sm:$0xff]   ;;  %v1439_v0 = vld [vmem:[#allocation4 + $0x190] ss:$8 sps:$4 sm:$0xff]   ;;  %v1442_v1 = vld [vmem:[#allocation4 + $0x80] ss:$8 sps:$4 sm:$0xff]  }
  0x49   :  { %709 = vmatpush1.bf16.msra.mxu0 %v1382_v22  ;;  %v1443_v2 = vld [vmem:[#allocation4 + $0x184] ss:$8 sps:$4 sm:$0xff]   ;;  %v1445_v3 = vld [vmem:[#allocation4 + $0x180] ss:$8 sps:$4 sm:$0xff]   ;;  %v1448_v5 = vld [vmem:[#allocation4 + $0x274] ss:$8 sps:$4 sm:$0xff]  }
  0x4a   :  { %710 = vmatprep.subr.bf16.mxu0 %v1386_v23  ;;  %750 = vmatpush1.bf16.msra.mxu1 %v1385_v24  ;;  %v82_v6 = vld [vmem:[#allocation2 + $0x10] sm:$0xff]  ;;  %v1451_v9 = vld [vmem:[#allocation4 + $0x264] ss:$8 sps:$4 sm:$0xff]   ;;  %v1491_v11 = vld [vmem:[#allocation4 + $0x300] ss:$8 sps:$4 sm:$0xff]   ;;  %v1615_v19 = vmov 0  }
  0x4b   :  { %751 = vmatprep.subr.bf16.mxu1 %v1389_v25  ;;  %v1446_v8 = vld [vmem:[#allocation4 + $0x270] ss:$8 sps:$4 sm:$0xff]   ;;  %v89_v10 = vpack.c.bf16 %v82_v6, %v82_v6  ;;  %v1493_v12 = vld [vmem:[#allocation4 + $0x304] ss:$8 sps:$4 sm:$0xff]   ;;  %v1449_v13 = vld [vmem:[#allocation4 + $0x260] ss:$8 sps:$4 sm:$0xff]  }
  0x4c   :  { %v1454_v14 = vld [vmem:[#allocation4 + $0x254] ss:$8 sps:$4 sm:$0xff]   ;;  %v1452_v18 = vld [vmem:[#allocation4 + $0x250] ss:$8 sps:$4 sm:$0xff]   ;;  %v1457_v20 = vld [vmem:[#allocation4 + $0x244] ss:$8 sps:$4 sm:$0xff]  }
  0x4d   :  { %711 = vmatpush1.bf16.msra.mxu0 %v1388_v26  ;;  %v86_v15 = vld [vmem:[#allocation2 + $0x30] sm:$0xff]  ;;  %v85_v16 = vld [vmem:[#allocation2 + $0x28] sm:$0xff]  ;;  %v1455_v22 = vld [vmem:[#allocation4 + $0x240] ss:$8 sps:$4 sm:$0xff]  }
  0x4e   :  { %712 = vmatprep.subr.bf16.mxu0 %v1392_v27  ;;  %752 = vmatpush1.bf16.msra.mxu1 %v1391_v28  ;;  %v92_v17 = vpack.c.bf16 %v85_v16, %v85_v16  ;;  %v93_v21 = vpack.c.bf16 %v86_v15, %v86_v15  ;;  %v1460_v23 = vld [vmem:[#allocation4 + $0x234] ss:$8 sps:$4 sm:$0xff]   ;;  %v1458_v24 = vld [vmem:[#allocation4 + $0x230] ss:$8 sps:$4 sm:$0xff]   ;;  %v1463_v25 = vld [vmem:[#allocation4 + $0x224] ss:$8 sps:$4 sm:$0xff]  }
  0x4f   :  { %753 = vmatprep.subr.bf16.mxu1 %v1395_v29  ;;  %v1461_v26 = vld [vmem:[#allocation4 + $0x220] ss:$8 sps:$4 sm:$0xff]   ;;  %v1466_v27 = vld [vmem:[#allocation4 + $0x214] ss:$8 sps:$4 sm:$0xff]   ;;  %v1464_v28 = vld [vmem:[#allocation4 + $0x210] ss:$8 sps:$4 sm:$0xff]  }
  0x50   :  { %v1469_v29 = vld [vmem:[#allocation4 + $0x204] ss:$8 sps:$4 sm:$0xff]   ;;  %v1494_v46 = vld [vmem:[#allocation4 + $0x280] ss:$8 sps:$4 sm:$0xff]  }
  0x51   :  { %713 = vmatpush1.bf16.msra.mxu0 %v1394_v30  ;;  %v1467_v30 = vld [vmem:[#allocation4 + $0x200] ss:$8 sps:$4 sm:$0xff]  }
  0x52   :  { %714 = vmatprep.subr.bf16.mxu0 %v1398_v31  ;;  %754 = vmatpush1.bf16.msra.mxu1 %v1397_v32  ;;  %v1472_v31 = vld [vmem:[#allocation4 + $0x2f4] ss:$8 sps:$4 sm:$0xff]   ;;  %v1470_v32 = vld [vmem:[#allocation4 + $0x2f0] ss:$8 sps:$4 sm:$0xff]   ;;  %v1498_v50 = vld [vmem:[#allocation6 + $0x38] sm:$0xff]  }
  0x53   :  { %755 = vmatprep.subr.bf16.mxu1 %v1401_v33  ;;  %v1475_v33 = vld [vmem:[#allocation4 + $0x2e4] ss:$8 sps:$4 sm:$0xff]  }
  0x54   :  { %v1500_v52 = vld [vmem:[#allocation6 + $0x30] sm:$0xff]  }
  0x55   :  { %715 = vmatpush2.bf16.msra.mxu0 %v1400_v34  ;;  %v1473_v34 = vld [vmem:[#allocation4 + $0x2e0] ss:$8 sps:$4 sm:$0xff]  }
  0x56   :  { %716 = vmatprep.subr.bf16.mxu0 %v1404_v35  ;;  %756 = vmatpush2.bf16.msra.mxu1 %v1403_v36  ;;  %v1478_v35 = vld [vmem:[#allocation4 + $0x2d4] ss:$8 sps:$4 sm:$0xff]   ;;  %v1476_v36 = vld [vmem:[#allocation4 + $0x2d0] ss:$8 sps:$4 sm:$0xff]  }
  0x57   :  { %757 = vmatprep.subr.bf16.mxu1 %v1407_v37  ;;  %v1481_v37 = vld [vmem:[#allocation4 + $0x2c4] ss:$8 sps:$4 sm:$0xff]  }
  0x59   :  { %717 = vmatpush2.bf16.msra.mxu0 %v1406_v38  ;;  %v1479_v38 = vld [vmem:[#allocation4 + $0x2c0] ss:$8 sps:$4 sm:$0xff]  }
  0x5a   :  { %718 = vmatprep.subr.bf16.mxu0 %v1410_v39  ;;  %758 = vmatpush2.bf16.msra.mxu1 %v1409_v40  ;;  %v1484_v39 = vld [vmem:[#allocation4 + $0x2b4] ss:$8 sps:$4 sm:$0xff]   ;;  %v1482_v40 = vld [vmem:[#allocation4 + $0x2b0] ss:$8 sps:$4 sm:$0xff]  }
  0x5b   :  { %759 = vmatprep.subr.bf16.mxu1 %v1413_v41  ;;  %v1487_v41 = vld [vmem:[#allocation4 + $0x2a4] ss:$8 sps:$4 sm:$0xff]  }
  0x5d   :  { %719 = vmatpush2.bf16.msra.mxu0 %v1412_v42  ;;  %v1485_v42 = vld [vmem:[#allocation4 + $0x2a0] ss:$8 sps:$4 sm:$0xff]  }
  0x5e   :  { %720 = vmatprep.subr.bf16.mxu0 %v1416_v43  ;;  %760 = vmatpush2.bf16.msra.mxu1 %v1415_v44  ;;  %v1490_v43 = vld [vmem:[#allocation4 + $0x294] ss:$8 sps:$4 sm:$0xff]   ;;  %v1488_v44 = vld [vmem:[#allocation4 + $0x290] ss:$8 sps:$4 sm:$0xff]  }
  0x5f   :  { %761 = vmatprep.subr.bf16.mxu1 %v1419_v45  ;;  %v1496_v45 = vld [vmem:[#allocation4 + $0x284] ss:$8 sps:$4 sm:$0xff]  }
  0x61   :  { %721 = vmatpush2.bf16.msra.mxu0 %v1418_v47  ;;  %v84_v47 = vld [vmem:[#allocation2 + $0x20] sm:$0xff] }
  0x62   :  { %722 = vmatprep.subr.bf16.mxu0 %v1422_v49  ;;  %762 = vmatpush2.bf16.msra.mxu1 %v1421_v51  ;;  %v91_v48 = vpack.c.bf16 %v84_v47, %v84_v47  ;;  %v1497_v49 = vld [vmem:[#allocation6 + $0x78] sm:$0xff]   ;;  %v1499_v51 = vld [vmem:[#allocation6 + $0x70] sm:$0xff]  }
  0x63   :  { %763 = vmatprep.subr.bf16.mxu1 %v1425_v53  ;;  %v1501_v53 = vld [vmem:[#allocation6 + $0x68] sm:$0xff]  }
  0x65   :  { %723 = vmatpush2.bf16.msra.mxu0 %v1424_v54  ;;  %v1502_v54 = vld [vmem:[#allocation6 + $0x28] sm:$0xff]  }
  0x66   :  { %724 = vmatprep.subr.bf16.mxu0 %v1428_v55  ;;  %764 = vmatpush2.bf16.msra.mxu1 %v1427_v56  ;;  %v1503_v55 = vld [vmem:[#allocation6 + $0x60] sm:$0xff]  }
  0x67   :  { %765 = vmatprep.subr.bf16.mxu1 %v1431_v57  ;;  %v1504_v56 = vld [vmem:[#allocation6 + $0x20] sm:$0xff]   ;;  %v1505_v57 = vld [vmem:[#allocation6 + $0x58] sm:$0xff]  }
  0x69   :  { %725 = vmatpush2.bf16.msra.mxu0 %v1430_v58  ;;  %v1506_v58 = vld [vmem:[#allocation6 + $0x18] sm:$0xff]  }
  0x6a   :  { %726 = vmatprep.subr.bf16.mxu0 %v1434_v59  ;;  %766 = vmatpush2.bf16.msra.mxu1 %v1433_v60  ;;  %v1507_v59 = vld [vmem:[#allocation6 + $0x50] sm:$0xff]  }
  0x6b   :  { %767 = vmatprep.subr.bf16.mxu1 %v1437_v61  ;;  %v1508_v60 = vld [vmem:[#allocation6 + $0x10] sm:$0xff]   ;;  %v1509_v61 = vld [vmem:[#allocation6 + $0x48] sm:$0xff]  }
  0x6d   :  { %727 = vmatpush2.bf16.msra.mxu0 %v1436_v62  ;;  %v1510_v62 = vld [vmem:[#allocation6 + $0x8] sm:$0xff]  }
  0x6e   :  { %728 = vmatprep.subr.bf16.mxu0 %v1440_v63  ;;  %768 = vmatpush2.bf16.msra.mxu1 %v1439_v0  ;;  %v1511_v63 = vld [vmem:[#allocation6 + $0x40] sm:$0xff]  }
  0x6f   :  { %769 = vmatprep.subr.bf16.mxu1 %v1443_v2  ;;  %v1512_v0 = vld [vmem:[#allocation6] sm:$0xff]  }
  0x71   :  { %729 = vmatpush2.bf16.msra.mxu0 %v1442_v1  ;;  %v1616_v1 = vmov 0.0  }
  0x72   :  { %780 = vmatprep.subr.bf16.mxu0 %v1448_v5  ;;  %770 = vmatpush2.bf16.msra.mxu1 %v1445_v3 }
  0x73   :  { %835 = vmatprep.subr.bf16.mxu1 %v1493_v12 }
  0x74   :  { %731 = vmatmul.mubr.bf16.vlgmr.msra.gmra.mxu0 %v87_v7 }
  0x75   :  { %781 = vmatpush1.bf16.msra.mxu0 %v1446_v8  ;;  %772 = vmatmul.mubr.bf16.vlgmr.msra.gmra.mxu1 %v89_v10 }
  0x76   :  { %782 = vmatprep.subr.bf16.mxu0 %v1451_v9  ;;  %836 = vmatpush1.bf16.msra.mxu1 %v1491_v11 }
  0x77   :  { %853 = vmatprep.mubr.bf16.mxu1 %v1615_v19  ;;  %812 = vmatprep.mubr.bf16.mxu0 %v92_v17  ;;  %v192_v17 = vld [vmem:[%s1694_s2] sm:$0x3] }
  0x78   :  { %1288 = vmatprep.subr.bf16.mxu1 %v1497_v49 }
  0x79   :  { %783 = vmatpush1.bf16.msra.mxu0 %v1449_v13 }
  0x7a   :  { %784 = vmatprep.subr.bf16.mxu0 %v1454_v14  ;;  %v194_v14 = vlaneseq }
  0x7c   :  { %v195_v15 = vshrl.u32 %v194_v14, 7 }
  0x7d   :  { %785 = vmatpush1.bf16.msra.mxu0 %v1452_v18  ;;  %1261 = vmatmul.mubr.msk.bf16.vlgmr.msra.gmra.mxu1 %vm694_vm0, %v93_v21 }
  0x7e   :  { %786 = vmatprep.subr.bf16.mxu0 %v1457_v20  ;;  %1289 = vmatpush3.bf16.msra.mxu1 %v1498_v50  ;;  %v196_v16 = vsub.s32 0, %v195_v15  ;;  %v200_v18 = vsub.s32 1, %v195_v15 }
  0x7f   :  { %1290 = vmatprep.subr.bf16.mxu1 %v1499_v51 }
  0x80   :  { %v197_v19 = vrot.slane %v192_v17, %v196_v16  ;;  %v201_v20 = vrot.slane %v192_v17, %v200_v18 }
  0x81   :  { %787 = vmatpush1.bf16.msra.mxu0 %v1455_v22 }
  0x82   :  { %788 = vmatprep.subr.bf16.mxu0 %v1460_v23  ;;  %1291 = vmatpush3.bf16.msra.mxu1 %v1500_v52 }
  0x83   :  { %1292 = vmatprep.subr.bf16.mxu1 %v1501_v53 }
  0x85   :  { %789 = vmatpush1.bf16.msra.mxu0 %v1458_v24 }
  0x86   :  { %790 = vmatprep.subr.bf16.mxu0 %v1463_v25  ;;  %1293 = vmatpush3.bf16.msra.mxu1 %v1502_v54  ;;  %v1279_v54 = vld [vmem:[%s1698_s6] ss:$0 sm:$0xff] }
  0x87   :  { %1294 = vmatprep.subr.bf16.mxu1 %v1503_v55 }
  0x89   :  { %791 = vmatpush1.bf16.msra.mxu0 %v1461_v26 }
  0x8a   :  { %792 = vmatprep.subr.bf16.mxu0 %v1466_v27  ;;  %1295 = vmatpush3.bf16.msra.mxu1 %v1504_v56 }
  0x8b   :  { %1296 = vmatprep.subr.bf16.mxu1 %v1505_v57 }
  0x8d   :  { %793 = vmatpush1.bf16.msra.mxu0 %v1464_v28 }
  0x8e   :  { %794 = vmatprep.subr.bf16.mxu0 %v1469_v29  ;;  %1297 = vmatpush3.bf16.msra.mxu1 %v1506_v58 }
  0x8f   :  { %1298 = vmatprep.subr.bf16.mxu1 %v1507_v59 }
  0x91   :  { %795 = vmatpush1.bf16.msra.mxu0 %v1467_v30 }
  0x92   :  { %796 = vmatprep.subr.bf16.mxu0 %v1472_v31  ;;  %1299 = vmatpush3.bf16.msra.mxu1 %v1508_v60 }
  0x93   :  { %1300 = vmatprep.subr.bf16.mxu1 %v1509_v61 }
  0x95   :  { %797 = vmatpush2.bf16.msra.mxu0 %v1470_v32 }
  0x96   :  { %798 = vmatprep.subr.bf16.mxu0 %v1475_v33  ;;  %1301 = vmatpush3.bf16.msra.mxu1 %v1510_v62 }
  0x97   :  { %1302 = vmatprep.subr.bf16.mxu1 %v1511_v63 }
  0x99   :  { %799 = vmatpush2.bf16.msra.mxu0 %v1473_v34 }
  0x9a   :  { %800 = vmatprep.subr.bf16.mxu0 %v1478_v35  ;;  %1303 = vmatpush3.bf16.msra.mxu1 %v1512_v0 }
  0x9b   :  { %1319 = vmatprep.subr.bf16.mxu1 %v1616_v1 }
  0x9d   :  { %801 = vmatpush2.bf16.msra.mxu0 %v1476_v36  ;;  %v1513_v36 = vld [vmem:[#allocation7 + $0x38] sm:$0xff]  }
  0x9e   :  { %802 = vmatprep.subr.bf16.mxu0 %v1481_v37 }
  0xa1   :  { %803 = vmatpush2.bf16.msra.mxu0 %v1479_v38  ;;  %v1514_v38 = vld [vmem:[#allocation7 + $0x30] sm:$0xff]  }
  0xa2   :  { %804 = vmatprep.subr.bf16.mxu0 %v1484_v39  ;;  %v1515_v39 = vld [vmem:[#allocation7 + $0x28] sm:$0xff]  }
  0xa5   :  { %805 = vmatpush2.bf16.msra.mxu0 %v1482_v40  ;;  %v1516_v40 = vld [vmem:[#allocation7 + $0x20] sm:$0xff]  }
  0xa6   :  { %806 = vmatprep.subr.bf16.mxu0 %v1487_v41  ;;  %v1517_v41 = vld [vmem:[#allocation7 + $0x18] sm:$0xff]  }
  0xa9   :  { %807 = vmatpush2.bf16.msra.mxu0 %v1485_v42  ;;  %v1518_v42 = vld [vmem:[#allocation7 + $0x10] sm:$0xff]  }
  0xaa   :  { %808 = vmatprep.subr.bf16.mxu0 %v1490_v43  ;;  %v1519_v43 = vld [vmem:[#allocation7 + $0x8] sm:$0xff]  }
  0xad   :  { %809 = vmatpush2.bf16.msra.mxu0 %v1488_v44  ;;  %v1520_v44 = vld [vmem:[#allocation7] sm:$0xff]  }
  0xae   :  { %810 = vmatprep.subr.bf16.mxu0 %v1496_v45 }
  0xb1   :  { %811 = vmatpush2.bf16.msra.mxu0 %v1494_v46  ;;  %v1262_v46 = vld [vmem:[%s1696_s4] ss:$0 sm:$0xff] }
  0xb4   :  { %813 = vmatmul.mubr.bf16.vlgmr.msra.gmra.mxu0 %v91_v48 }
 0x134   :  { %v732_v2 = vpop.f32.mrf.mxu0 }
 0x135   :  { %v773_v4 = vpop.f32.mrf.mxu1  ;;  %v733_v21 = vadd.f32 %v732_v2, %v197_v19 }
 0x136   :  { %v734_v3 = vpop.f32.mrf.mxu0 }
 0x137   :  { %v775_v6 = vpop.f32.mrf.mxu1  ;;  %v735_v22 = vadd.f32 %v734_v3, %v201_v20  ;;  %v774_v23 = vadd.f32 %v773_v4, %v733_v21 }
 0x138   :  { %v736_v5 = vpop.f32.mrf.mxu0 }
 0x139   :  { %v777_v8 = vpop.f32.mrf.mxu1  ;;  %v776_v25 = vadd.f32 %v775_v6, %v735_v22 }
 0x13a   :  { %v737_v7 = vpop.f32.mrf.mxu0 }
 0x13b   :  { %v778_v9 = vpop.f32.mrf.mxu1 }
 0x13d   :  { %v855_v10 = vpop.f32.mrf.mxu1 }
 0x13f   :  { %v857_v11 = vpop.f32.mrf.mxu1 }
 0x141   :  { %v859_v12 = vpop.f32.mrf.mxu1 }
 0x143   :  { %v860_v13 = vpop.f32.mrf.mxu1 }
 0x174   :  { %v814_v24 = vpop.f32.mrf.mxu0 }
 0x175   :  { %v815_v26 = vadd.f32 %v814_v24, %v774_v23 }
 0x176   :  { %v816_v27 = vpop.f32.mrf.mxu0 }
 0x177   :  { %v856_v28 = vadd.f32 %v855_v10, %v815_v26  ;;  %v817_v29 = vadd.f32 %v816_v27, %v776_v25 }
 0x178   :  { %v818_v30 = vpop.f32.mrf.mxu0 }
 0x179   :  { %v858_v31 = vadd.f32 %v857_v11, %v817_v29  ;;  %v862_v32 = vmax.f32 %v856_v28, 0.0 }
 0x17a   :  { %v819_v33 = vpop.f32.mrf.mxu0 }
 0x17b   :  { %v863_v34 = vmax.f32 %v858_v31, 0.0  ;;  %v864_v37 = vpack.c.bf16 %v862_v32, %v862_v32 }
 0x17d   :  { %v865_v35 = vpack.c.bf16 %v863_v34, %v863_v34 }
 0x17f   :  { %1033 = vmatprep.mubr.bf16.mxu1 %v865_v35 }
 0x180   :  { %1034 = vmatmul.mubr.bf16.vlgmr.msra.gmra.mxu1 %v864_v37 }
 0x181   :  { %1320 = vmatpush3.bf16.msra.mxu1 %v1513_v36  ;;  %1335 = vmatprep.mubr.msk.bf16.mxu1 %vm1617_vm1, %v1616_v1 }
 0x182   :  { %1321 = vmatprep.subr.bf16.mxu1 %v1616_v1 }
 0x185   :  { %1322 = vmatpush3.bf16.msra.mxu1 %v1514_v38 }
 0x186   :  { %1323 = vmatprep.subr.bf16.mxu1 %v1616_v1 }
 0x189   :  { %1324 = vmatpush3.bf16.msra.mxu1 %v1515_v39 }
 0x18a   :  { %1325 = vmatprep.subr.bf16.mxu1 %v1616_v1 }
 0x18d   :  { %1326 = vmatpush3.bf16.msra.mxu1 %v1516_v40 }
 0x18e   :  { %1327 = vmatprep.subr.bf16.mxu1 %v1616_v1 }
 0x191   :  { %1328 = vmatpush3.bf16.msra.mxu1 %v1517_v41 }
 0x192   :  { %1329 = vmatprep.subr.bf16.mxu1 %v1616_v1 }
 0x195   :  { %1330 = vmatpush3.bf16.msra.mxu1 %v1518_v42 }
 0x196   :  { %1331 = vmatprep.subr.bf16.mxu1 %v1616_v1 }
 0x199   :  { %1332 = vmatpush3.bf16.msra.mxu1 %v1519_v43 }
 0x19a   :  { %1333 = vmatprep.subr.bf16.mxu1 %v1616_v1 }
 0x19d   :  { %1334 = vmatpush3.bf16.msra.mxu1 %v1520_v44 }
 0x240   :  { %v1304_v45 = vpop.f32.mrf.mxu1 }
 0x242   :  { %v1305_v47 = vpop.f32.mrf.mxu1 }
 0x243   :  { %v1306_v48 = vadd.f32 %v1305_v47, %v1304_v45 }
 0x244   :  { %v1307_v49 = vpop.f32.mrf.mxu1 }
 0x245   :  { %v1036_v50 = vadd.f32 %v1306_v48, %v1262_v46 }
 0x246   :  { %v1308_v51 = vpop.f32.mrf.mxu1 }
 0x247   :  { %v1041_v52 = vmax.f32 %v1036_v50, 0.0 }
 0x249   :  { %v1042_v53 = vpack.c.bf16 %v1041_v52, %v1041_v52 }
 0x24b   :  { %1336 = vmatmul.mubr.bf16.vlgmr.msra.gmra.mxu1 %v1042_v53 }
 0x30b   :  { %v1148_v55 = vpop.f32.mrf.mxu1 }
 0x30c   :  { %v1149_v56 = vadd.f32 %v1279_v54, %v1148_v55 }
 0x30d   :  { %v1337_v57 = vpop.f32.mrf.mxu1 }
 0x30e   :  { %v1154_v58 = vpack.c.bf16 %v1149_v56, %v1149_v56 }
 0x30f   :  { %v1151_v59 = vpop.f32.mrf.mxu1 }
 0x310   :  { %1155 = vst [vmem:[%s1699_s7] sm:$0xf] %v1154_v58 }
 0x311   :  { %v1338_v60 = vpop.f32.mrf.mxu1 }
 0x312   :  { %1160 = vsyncpa [#allocation3], 1 }
 0x313   :  { %1161 = vsyncpa [#allocation5], 1 }
 0x314   :  { %1162 = vsyncpa [#allocation8], 1 }

</bundles_post_ra>
